<compile_context>
chip_gen: v7x
topology: tpu7x:2x2x1
jax: 0.10.0
libtpu: 0.0.40
codegen_flags: <defaults>
</compile_context>

<pallas_src>
import jax
import jax.numpy as jnp
from jax.experimental import pallas as pl
from jax.experimental.pallas import tpu as pltpu

PERCEPTUAL_WEIGHT = 0.8
EDGE_WEIGHT = 0.2

# Per-step working-set target: keeps >=256-row strips at 1080p f32 while
# leaving double-buffering headroom on v7x (64 MiB physical VMEM); bf16
# inputs automatically get ~2x taller strips.
_TARGET_WORKING_SET_BYTES = 32 * 1024 * 1024
_VMEM_LIMIT_CAP_BYTES = 56 * 1024 * 1024


def _choose_strip_rows(min_h, min_w, in_itemsize, cmp_itemsize,
                       max_strip_rows=None):
    """Pick the H-strip height (a multiple of 8, or the full height)."""
    # Bytes per strip row: 2 tensors x 2 pipeline buffers of the input dtype
    # plus ~6 rows worth of compute-dtype temporaries (diff / abs / eh / ew / e).
    per_row = min_w * (2 * 2 * in_itemsize + 6 * cmp_itemsize)
    rows = _TARGET_WORKING_SET_BYTES // max(per_row, 1)
    if max_strip_rows is not None:
        rows = min(rows, max_strip_rows)
    rows = int(max(8, min(min_h, rows)))
    if rows >= min_h:
        return min_h, 1
    # Prefer an exact multiple-of-8 divisor of min_h (no ragged last strip).
    best = 0
    d = 8
    while d <= rows:
        if min_h % d == 0:
            best = d
        d += 8
    if best == 0:
        best = (rows // 8) * 8  # ragged last strip -> in-kernel row mask
    return best, int(pl.cdiv(min_h, best))


def _make_kernel(*, strip_h, min_h, min_w, num_strips, compute_dtype,
                 has_edge, needs_row_mask):
    """Builds the per-(b*c, strip) kernel body."""
    multi_strip = num_strips > 1

    def kernel(sr_ref, hr_ref, perc_ref, edge_ref, *scratch):
        s = pl.program_id(1)

        @pl.when(s == 0)
        def _init():
            perc_ref[...] = jnp.zeros_like(perc_ref)
            edge_ref[...] = jnp.zeros_like(edge_ref)

        # (strip_h, min_w) slice of one (b, c) image.  Compute in bf16 when the
        # inputs are bf16 (v6e/v7x VPU); accumulate in f32 only.
        sr = sr_ref[0].astype(compute_dtype)
        hr = hr_ref[0].astype(compute_dtype)

        if needs_row_mask:
            # Global row ids; rows >= min_h are padding of the ragged last strip.
            row = s * strip_h + jax.lax.broadcasted_iota(
                jnp.int32, (strip_h, 1), 0)

        # ---- perceptual L1 partial (sublane reduce; lanes stay resident) ----
        d = jnp.abs(sr - hr)
        if needs_row_mask:
            d = jnp.where(row < min_h, d, jnp.zeros_like(d))
        perc_ref[...] += jnp.sum(
            d.astype(jnp.float32), axis=0, keepdims=True).reshape(1, 1, min_w)

        if has_edge:
            # ---- fused edge partial on the (strip_h-1, min_w-1) window ----
            # Shared corner sub-blocks avoid a second slicing pass over eh/ew.
            a = sr[:-1, :-1]
            b = hr[:-1, :-1]
            eh = jnp.abs(sr[1:, :-1] - a) - jnp.abs(hr[1:, :-1] - b)
            ew = jnp.abs(sr[:-1, 1:] - a) - jnp.abs(hr[:-1, 1:] - b)
            e = jnp.abs(eh + ew)  # (strip_h-1, min_w-1)
            if needs_row_mask:
                e = jnp.where(row[:-1] + 1 < min_h, e, jnp.zeros_like(e))
            edge_ref[...] += jnp.sum(
                e.astype(jnp.float32), axis=0, keepdims=True
            ).reshape(1, 1, min_w - 1)

            if multi_strip:
                carry_ref, = scratch

                # Cross-strip edge row: previous strip's last row (carried in
                # VMEM -- the strip axis is sequential) vs this strip's first
                # row.  Both rows are always in-bounds.
                @pl.when(s > 0)
                def _boundary():
                    p_sr = carry_ref[0:1, :]
                    p_hr = carry_ref[1:2, :]
                    beh = (jnp.abs(sr[0:1, :min_w - 1] - p_sr[:, :min_w - 1])
                           - jnp.abs(hr[0:1, :min_w - 1] - p_hr[:, :min_w - 1]))
                    bew = (jnp.abs(p_sr[:, 1:] - p_sr[:, :min_w - 1])
                           - jnp.abs(p_hr[:, 1:] - p_hr[:, :min_w - 1]))
                    be = jnp.abs(beh + bew).astype(jnp.float32)
                    edge_ref[...] += be.reshape(1, 1, min_w - 1)

                # Save this strip's last row for the next strip.  On the ragged
                # last strip this may hold padding, but it is never read (the
                # next grid step restarts at s == 0).
                carry_ref[0:1, :] = sr[strip_h - 1:strip_h, :]
                carry_ref[1:2, :] = hr[strip_h - 1:strip_h, :]

    return kernel


def hybrid_loss(sr, hr, *, max_strip_rows=None):
    """Pallas TPU implementation of HybridLoss.forward. Returns f32 scalar."""
    if sr.dtype != hr.dtype:
        common = jnp.promote_types(sr.dtype, hr.dtype)
        sr = sr.astype(common)
        hr = hr.astype(common)

    # Static crop to the common spatial window (same as the torch slicing);
    # skipped entirely when the shapes already match.
    min_h = min(sr.shape[2], hr.shape[2])
    min_w = min(sr.shape[3], hr.shape[3])
    sr_c = sr if sr.shape[2:] == (min_h, min_w) else sr[:, :, :min_h, :min_w]
    hr_c = hr if hr.shape[2:] == (min_h, min_w) else hr[:, :, :min_h, :min_w]

    b, c = sr_c.shape[0], sr_c.shape[1]
    n = b * c
    sr_f = sr_c.reshape(n, min_h, min_w)
    hr_f = hr_c.reshape(n, min_h, min_w)

    in_dtype = jnp.dtype(sr_f.dtype)
    compute_dtype = (jnp.bfloat16 if in_dtype == jnp.dtype(jnp.bfloat16)
                     else jnp.float32)
    in_itemsize = in_dtype.itemsize
    cmp_itemsize = jnp.dtype(compute_dtype).itemsize

    strip_h, num_strips = _choose_strip_rows(
        min_h, min_w, in_itemsize, cmp_itemsize, max_strip_rows)
    needs_row_mask = (min_h % strip_h) != 0
    has_edge = (min_h >= 2) and (min_w >= 2)
    edge_w = (min_w - 1) if has_edge else 1

    kernel = _make_kernel(strip_h=strip_h, min_h=min_h, min_w=min_w,
                          num_strips=num_strips, compute_dtype=compute_dtype,
                          has_edge=has_edge, needs_row_mask=needs_row_mask)

    scratch_shapes = []
    if has_edge and num_strips > 1:
        scratch_shapes.append(pltpu.VMEM((2, min_w), compute_dtype))

    perc_size = n * min_h * min_w
    edge_size = n * (min_h - 1) * (min_w - 1)

    step_bytes = strip_h * min_w * (2 * 2 * in_itemsize + 6 * cmp_itemsize)
    vmem_limit = int(min(_VMEM_LIMIT_CAP_BYTES,
                         max(32 * 1024 * 1024, int(step_bytes * 1.5))))

    in_bytes = 2 * perc_size * in_itemsize
    out_bytes = n * (min_w + edge_w) * 4

    perc_rows, edge_rows = pl.pallas_call(
        kernel,
        out_shape=(jax.ShapeDtypeStruct((n, 1, min_w), jnp.float32),
                   jax.ShapeDtypeStruct((n, 1, edge_w), jnp.float32)),
        grid_spec=pltpu.PrefetchScalarGridSpec(
            num_scalar_prefetch=0,
            grid=(n, num_strips),
            in_specs=[
                pl.BlockSpec((1, strip_h, min_w), lambda i, s: (i, s, 0)),
                pl.BlockSpec((1, strip_h, min_w), lambda i, s: (i, s, 0)),
            ],
            out_specs=[
                pl.BlockSpec((1, 1, min_w), lambda i, s: (i, 0, 0)),
                pl.BlockSpec((1, 1, edge_w), lambda i, s: (i, 0, 0)),
            ],
            scratch_shapes=scratch_shapes,
        ),
        compiler_params=pltpu.CompilerParams(
            # N axis is independent ("parallel" -> both TCs on v7x megacore);
            # the strip axis carries the output-row accumulators + boundary row.
            dimension_semantics=("parallel", "arbitrary"),
            vmem_limit_bytes=vmem_limit,
        ),
        cost_estimate=pl.CostEstimate(
            flops=13 * perc_size,
            transcendentals=0,
            bytes_accessed=int(in_bytes + out_bytes),
        ),
    )(sr_f, hr_f)

    loss = (PERCEPTUAL_WEIGHT / float(perc_size)) * jnp.sum(perc_rows)
    if has_edge and edge_size > 0:
        loss = loss + (EDGE_WEIGHT / float(edge_size)) * jnp.sum(edge_rows)
    # else: degenerate edge window (min_h == 1 or min_w == 1): the torch module
    # would take the mean of an empty tensor (NaN); we define the edge term as 0.
    return loss


def _reference_loss(sr, hr):
    # Pure-JAX reference mirroring the PyTorch module, for a sanity check.
    min_h = min(sr.shape[2], hr.shape[2])
    min_w = min(sr.shape[3], hr.shape[3])
    sr = sr[:, :, :min_h, :min_w].astype(jnp.float32)
    hr = hr[:, :, :min_h, :min_w].astype(jnp.float32)
    perceptual = jnp.mean(jnp.abs(sr - hr))
    sr_eh = jnp.abs(sr[:, :, 1:, :] - sr[:, :, :-1, :])
    sr_ew = jnp.abs(sr[:, :, :, 1:] - sr[:, :, :, :-1])
    hr_eh = jnp.abs(hr[:, :, 1:, :] - hr[:, :, :-1, :])
    hr_ew = jnp.abs(hr[:, :, :, 1:] - hr[:, :, :, :-1])
    sr_edges = sr_eh[:, :, :, :-1] + sr_ew[:, :, :-1, :]
    hr_edges = hr_eh[:, :, :, :-1] + hr_ew[:, :, :-1, :]
    edge = jnp.mean(jnp.abs(sr_edges - hr_edges))
    return PERCEPTUAL_WEIGHT * perceptual + EDGE_WEIGHT * edge


if __name__ == "__main__":
    key = jax.random.PRNGKey(0)
    keys = jax.random.split(key, 8)

    def _check(sr, hr, atol, rtol, **kw):
        out = jax.block_until_ready(hybrid_loss(sr, hr, **kw))
        ref = jax.block_until_ready(_reference_loss(sr, hr))
        assert jnp.allclose(out, ref, atol=atol, rtol=rtol), (out, ref, kw)

    # 1) Matched NCHW shapes, single-strip path.
    sr = jax.random.normal(keys[0], (2, 4, 16, 16), dtype=jnp.float32)
    hr = jax.random.normal(keys[1], (2, 4, 16, 16), dtype=jnp.float32)
    _check(sr, hr, 1e-5, 1e-5)

    # 2) Mismatched spatial shapes -> crop path.
    sr2 = jax.random.normal(keys[2], (2, 4, 18, 20), dtype=jnp.float32)
    hr2 = jax.random.normal(keys[3], (2, 4, 16, 16), dtype=jnp.float32)
    _check(sr2, hr2, 1e-5, 1e-5)

    # 3) Multi-strip path (strip_h = 8 divides H): boundary-row carry.
    sr3 = jax.random.normal(keys[4], (2, 2, 24, 16), dtype=jnp.float32)
    hr3 = jax.random.normal(keys[5], (2, 2, 24, 16), dtype=jnp.float32)
    _check(sr3, hr3, 1e-5, 1e-5, max_strip_rows=8)

    # 4) Multi-strip with a ragged last strip: in-kernel row mask.
    sr4 = jax.random.normal(keys[6], (2, 2, 20, 16), dtype=jnp.float32)
    hr4 = jax.random.normal(keys[7], (2, 2, 20, 16), dtype=jnp.float32)
    _check(sr4, hr4, 1e-5, 1e-5, max_strip_rows=8)

    # 5) bf16 inputs: compute in bf16, accumulate in f32 (v6e/v7x path).
    _check(sr.astype(jnp.bfloat16), hr.astype(jnp.bfloat16), 1e-2, 3e-2)

    print("KERNEL_OK")
</pallas_src>

<mosaic_0001>
module attributes {stable_mosaic.version = 11 : i64} {
  func.func @kernel(%arg0: i32, %arg1: i32, %arg2: memref<1x16x16xf32, #tpu.memory_space<vmem>>, %arg3: memref<1x16x16xf32, #tpu.memory_space<vmem>>, %arg4: memref<1x1x16xf32, #tpu.memory_space<vmem>>, %arg5: memref<1x1x15xf32, #tpu.memory_space<vmem>>) attributes {dimension_semantics = [#tpu.dimension_semantics<parallel>, #tpu.dimension_semantics<arbitrary>], iteration_bounds = array<i64: 8, 1>, scalar_prefetch = 0 : i64, scratch_operands = 0 : i64, tpu.core_type = #tpu.core_type<tc>, window_params = [{transform_indices = @transform_0, window_bounds = array<i64: 1, 16, 16>}, {transform_indices = @transform_1, window_bounds = array<i64: 1, 16, 16>}, {transform_indices = @transform_2, window_bounds = array<i64: 1, 1, 16>}, {transform_indices = @transform_3, window_bounds = array<i64: 1, 1, 15>}]} {
    %c0_i32 = arith.constant 0 : i32
    %0 = arith.cmpi eq, %arg1, %c0_i32 : i32
    %1 = arith.extui %0 : i1 to i32
    %c0_i32_0 = arith.constant 0 : i32
    %2 = arith.cmpi ne, %1, %c0_i32_0 : i32
    scf.if %2 {
      %cst_19 = arith.constant 0.000000e+00 : f32
      %39 = vector.broadcast %cst_19 : f32 to vector<1x1x16xf32>
      %c0_20 = arith.constant 0 : index
      %c0_21 = arith.constant 0 : index
      %c0_22 = arith.constant 0 : index
      %40 = vector.load %arg4[%c0_20, %c0_21, %c0_22] : memref<1x1x16xf32, #tpu.memory_space<vmem>>, vector<1x1x16xf32>
      tpu.vector_store %arg4[%c0_20, %c0_21, %c0_22], %39 {strides = array<i32>} : memref<1x1x16xf32, #tpu.memory_space<vmem>>, vector<1x1x16xf32>,
      %cst_23 = arith.constant 0.000000e+00 : f32
      %41 = vector.broadcast %cst_23 : f32 to vector<1x1x15xf32>
      %c0_24 = arith.constant 0 : index
      %c0_25 = arith.constant 0 : index
      %c0_26 = arith.constant 0 : index
      %42 = vector.load %arg5[%c0_24, %c0_25, %c0_26] : memref<1x1x15xf32, #tpu.memory_space<vmem>>, vector<1x1x15xf32>
      tpu.vector_store %arg5[%c0_24, %c0_25, %c0_26], %41 {strides = array<i32>} : memref<1x1x15xf32, #tpu.memory_space<vmem>>, vector<1x1x15xf32>,
    } else {
    }
    %c0 = arith.constant 0 : index
    %c0_1 = arith.constant 0 : index
    %c0_2 = arith.constant 0 : index
    %3 = vector.load %arg2[%c0, %c0_1, %c0_2] : memref<1x16x16xf32, #tpu.memory_space<vmem>>, vector<1x16x16xf32>
    %4 = vector.shape_cast %3 : vector<1x16x16xf32> to vector<16x16xf32>
    %c0_3 = arith.constant 0 : index
    %c0_4 = arith.constant 0 : index
    %c0_5 = arith.constant 0 : index
    %5 = vector.load %arg3[%c0_3, %c0_4, %c0_5] : memref<1x16x16xf32, #tpu.memory_space<vmem>>, vector<1x16x16xf32>
    %6 = vector.shape_cast %5 : vector<1x16x16xf32> to vector<16x16xf32>
    %7 = arith.subf %4, %6 : vector<16x16xf32>
    %8 = math.absf %7 : vector<16x16xf32>
    %c0_6 = arith.constant 0 : index
    %c0_7 = arith.constant 0 : index
    %c0_8 = arith.constant 0 : index
    %9 = vector.load %arg4[%c0_6, %c0_7, %c0_8] : memref<1x1x16xf32, #tpu.memory_space<vmem>>, vector<1x1x16xf32>
    %cst = arith.constant dense<0.000000e+00> : vector<16xf32>
    %10 = vector.multi_reduction <add>, %8, %cst [0] : vector<16x16xf32> to vector<16xf32>
    %11 = vector.shape_cast %10 : vector<16xf32> to vector<1x16xf32>
    %12 = vector.shape_cast %11 : vector<1x16xf32> to vector<1x1x16xf32>
    %13 = arith.addf %9, %12 : vector<1x1x16xf32>
    %c0_9 = arith.constant 0 : index
    %c0_10 = arith.constant 0 : index
    %c0_11 = arith.constant 0 : index
    %14 = vector.load %arg4[%c0_9, %c0_10, %c0_11] : memref<1x1x16xf32, #tpu.memory_space<vmem>>, vector<1x1x16xf32>
    tpu.vector_store %arg4[%c0_9, %c0_10, %c0_11], %13 {strides = array<i32>} : memref<1x1x16xf32, #tpu.memory_space<vmem>>, vector<1x1x16xf32>,
    %15 = vector.extract_strided_slice %4 {offsets = [0, 0], sizes = [15, 15], strides = [1, 1]} : vector<16x16xf32> to vector<15x15xf32>
    %16 = vector.extract_strided_slice %6 {offsets = [0, 0], sizes = [15, 15], strides = [1, 1]} : vector<16x16xf32> to vector<15x15xf32>
    %17 = vector.extract_strided_slice %4 {offsets = [1, 0], sizes = [15, 15], strides = [1, 1]} : vector<16x16xf32> to vector<15x15xf32>
    %18 = arith.subf %17, %15 : vector<15x15xf32>
    %19 = math.absf %18 : vector<15x15xf32>
    %20 = vector.extract_strided_slice %6 {offsets = [1, 0], sizes = [15, 15], strides = [1, 1]} : vector<16x16xf32> to vector<15x15xf32>
    %21 = arith.subf %20, %16 : vector<15x15xf32>
    %22 = math.absf %21 : vector<15x15xf32>
    %23 = arith.subf %19, %22 : vector<15x15xf32>
    %24 = vector.extract_strided_slice %4 {offsets = [0, 1], sizes = [15, 15], strides = [1, 1]} : vector<16x16xf32> to vector<15x15xf32>
    %25 = arith.subf %24, %15 : vector<15x15xf32>
    %26 = math.absf %25 : vector<15x15xf32>
    %27 = vector.extract_strided_slice %6 {offsets = [0, 1], sizes = [15, 15], strides = [1, 1]} : vector<16x16xf32> to vector<15x15xf32>
    %28 = arith.subf %27, %16 : vector<15x15xf32>
    %29 = math.absf %28 : vector<15x15xf32>
    %30 = arith.subf %26, %29 : vector<15x15xf32>
    %31 = arith.addf %23, %30 : vector<15x15xf32>
    %32 = math.absf %31 : vector<15x15xf32>
    %c0_12 = arith.constant 0 : index
    %c0_13 = arith.constant 0 : index
    %c0_14 = arith.constant 0 : index
    %33 = vector.load %arg5[%c0_12, %c0_13, %c0_14] : memref<1x1x15xf32, #tpu.memory_space<vmem>>, vector<1x1x15xf32>
    %cst_15 = arith.constant dense<0.000000e+00> : vector<15xf32>
    %34 = vector.multi_reduction <add>, %32, %cst_15 [0] : vector<15x15xf32> to vector<15xf32>
    %35 = vector.shape_cast %34 : vector<15xf32> to vector<1x15xf32>
    %36 = vector.shape_cast %35 : vector<1x15xf32> to vector<1x1x15xf32>
    %37 = arith.addf %33, %36 : vector<1x1x15xf32>
    %c0_16 = arith.constant 0 : index
    %c0_17 = arith.constant 0 : index
    %c0_18 = arith.constant 0 : index
    %38 = vector.load %arg5[%c0_16, %c0_17, %c0_18] : memref<1x1x15xf32, #tpu.memory_space<vmem>>, vector<1x1x15xf32>
    tpu.vector_store %arg5[%c0_16, %c0_17, %c0_18], %37 {strides = array<i32>} : memref<1x1x15xf32, #tpu.memory_space<vmem>>, vector<1x1x15xf32>,
    return
  }
  func.func @transform_0(%arg0: i32, %arg1: i32) -> (i32, i32, i32) {
    %c0_i32 = arith.constant 0 : i32
    %c0_i32_0 = arith.constant 0 : i32
    return %arg0, %arg1, %c0_i32 : i32, i32, i32
  }
  func.func @transform_1(%arg0: i32, %arg1: i32) -> (i32, i32, i32) {
    %c0_i32 = arith.constant 0 : i32
    %c0_i32_0 = arith.constant 0 : i32
    return %arg0, %arg1, %c0_i32 : i32, i32, i32
  }
  func.func @transform_2(%arg0: i32, %arg1: i32) -> (i32, i32, i32) {
    %c0_i32 = arith.constant 0 : i32
    %c0_i32_0 = arith.constant 0 : i32
    %c0_i32_1 = arith.constant 0 : i32
    return %arg0, %c0_i32, %c0_i32_0 : i32, i32, i32
  }
  func.func @transform_3(%arg0: i32, %arg1: i32) -> (i32, i32, i32) {
    %c0_i32 = arith.constant 0 : i32
    %c0_i32_0 = arith.constant 0 : i32
    %c0_i32_1 = arith.constant 0 : i32
    return %arg0, %c0_i32, %c0_i32_0 : i32, i32, i32
  }
}

</mosaic_0001>

<bundles_post_ra>
// kernel: tpu_custom_call.1
= control target key start
LH: loop header
LB: loop body
LE: loop exit
PB: predicated region body
PF: predicated region fallthrough
CT: control target
= control target key end

     0   :  { %9 = vsyncpa [#allocation3], 0  ;;  %s1149_s0 = inlined_call_operand.hbm [shape: f32[8,16,16], index: 0, kind: input, shape index: {}]   ;;  %s1150_s1 = inlined_call_operand.hbm [shape: f32[8,16,16], index: 1, kind: input, shape index: {}]   ;;  %s1151_s2 = inlined_call_operand.hbm [shape: f32[8,1,16], index: 2, kind: output, shape index: {0}]   ;;  %s1152_s3 = inlined_call_operand.hbm [shape: f32[8,1,15], index: 3, kind: output, shape index: {1}]  }
   0x1   :  { %11 = vsyncpa [#allocation3 + $0x1], 0 }
   0x2   :  { %12 = vsyncpa [#allocation6], 0 }
   0x3   :  { %14 = vsyncpa [#allocation6 + $0x1], 0 }
   0x4   :  { %15 = vsyncpa [#allocation4], 0 }
   0x5   :  { %17 = vsyncpa [#allocation4 + $0x1], 0 }
   0x6   :  { %18 = vsyncpa [#allocation9], 0 }
   0x7   :  { %20 = vsyncpa [#allocation9 + $0x1], 0  ;;  %s841_s12 = smov 0   ;;  %s843_s13 = smov 0  }
   0x8   :  { %s845_s14 = smov 0   ;;  %s847_s15 = smov 0  }
   0x9   :  { %s849_s16 = smov 0   ;;  %s851_s17 = smov 0  }
   0xa LB: > { %s536_s18 = sadd.s32 4294967295, %s810_s17   ;;  %s537_s19 = sadd.s32 4294967294, %s810_s17   ;;  %s810_s17 = sphi %s851_s17, %s26_s17   ;;  %s806_s16 = sphi %s849_s16, %s1169_s16   ;;  %s802_s15 = sphi %s847_s15, %s1168_s15   ;;  %s798_s14 = sphi %s845_s14, %s1167_s14   ;;  %s794_s13 = sphi %s843_s13, %s1166_s13   ;;  %s790_s12 = sphi %s841_s12, %s1165_s12  }
   0xb   : > { %s38_s20 = sadd.s32 1, %s806_s16  ;;  %s47_s21 = sadd.s32 1, %s798_s14 }
   0xc   : > { %p40_p0 = scmp.ge.s32.totalorder %s38_s20, 8  ;;  %p54_p1 = scmp.ne.s32.totalorder %s798_s14, %s794_s13 }
   0xd   : > { %p55_p2 = scmp.eq.s32.totalorder %s810_s17, 0  ;;  %p60_p3 = scmp.ne.s32.totalorder %s794_s13, %s790_s12 }
   0xe   : > { %s1171_s20 = smov (%p40_p0, %s38_s20), 0  ;;  %p61_p5 = scmp.eq.s32.totalorder %s536_s18, 0 }
   0xf   : > { %p882_p4 = por %p55_p2, %p54_p1  ;;  %s42_s23 = ssub.s32 %s806_s16, %s1171_s20 }
  0x10   : > { %p112_p6 = scmp.eq.s32.totalorder %s536_s18, 7  ;;  %p45_p7 = scmp.eq.s32.totalorder %s42_s23, 0 }
  0x11   : > { %p888_p8 = por %p61_p5, %p60_p3  ;;  %p118_p10 = scmp.eq.s32.totalorder %s537_s19, 7 }
  0x12   : > { %p892_p9 = por %p112_p6, %p54_p1  ;;  %p577_p12 = scmp.lt.s32.totalorder %s810_s17, 8 }
  0x13   : > { %s1156_s24 = scalar_select %p888_p8, 1, 0 }
  0x14   : > { %s1157_s25 = scalar_select %p892_p9, 1, 0 }
  0x15   : > { %s897_s26 = scalar_select %p45_p7, %s798_s14, %s47_s21  }
  0x16   : > { %p899_p11 = por %p118_p10, %p60_p3  ;;  %s905_s28 = sand.u32 1, %s798_s14  }
  0x17   : > { %s540_s29 = sshll.u32 %s905_s28, 4  ;;  %s553_s30 = sshll.u32 %s806_s16, 8 }
  0x18   : > { %s1158_s27 = scalar_select %p899_p11, 1, 0 }
  0x19   : > { %s914_s6 = scalar_lea.hbm %s1149_s0, %s553_s30  ;;  %s168_s7 = scalar_lea.vmem [#allocation2], %s540_s29 }
  0x1a   : > { %s177_s8 = sshll.u32 %s168_s7, 4  ;;  %p922_p13 = pnand %p577_p12, %p882_p4  ;;  %s918_s8 = int_to_ptr.vmem [resolvable:$true] %s177_s8 }
  0x1b   : > { %s165_s10 = scalar_lea.sflag [#allocation3], %s905_s28  ;;  %s632_s11 = scalar_lea.hbm %s914_s6, 256 }
  0x1c   : > { %p633_p1 = scmp.ne.s32.totalorder %s914_s6, %s632_s11  ;;  %p634_p2 = pneg %p922_p13 }
  0x1d   : > { %s637_s21 = scalar_lea.hbm %s1149_s0, 2048  ;;  %p638_p4 = scmp.lt.u32.totalorder %s914_s6, %s1149_s0 }
  0x1e   : > { %p635_p3 = pnand %p634_p2, %p633_p1  ;;  %p639_p6 = scmp.lt.u32.totalorder %s637_s21, %s632_s11 }
  0x1f   : > { %p641_p10 = scmp.lt.u32.totalorder %s632_s11, %s914_s6 }
  0x20   : > { %p636_p5 = pneg %p635_p3  ;;  %p640_p7 = por %p639_p6, %p638_p4 }
  0x22   : > { %p642_p12 = por %p641_p10, %p640_p7 }
  0x24   : > { %p643_p0 = pnand %p642_p12, %p636_p5 }
  0x26   : > { %646 = shalt.err (!%p643_p0)
}
  0x27   : > { %s647_s4 = scalar_lea.vmem %s918_s8, 256  ;;  %s812_s5 = smov [#allocation2]  }
  0x28   : > { %p648_p1 = scmp.ne.s32.totalorder %s918_s8, %s647_s4  ;;  %s652_s7 = sshll.u32 %s812_s5, 4  ;;  %s653_s7 = int_to_ptr.vmem [resolvable:$false] %s652_s7 }
  0x29   : > { %s654_s18 = scalar_lea.vmem %s653_s7, 512  ;;  %p655_p9 = scmp.lt.s32.totalorder %s918_s8, %s653_s7 }
  0x2a   : > { %p650_p3 = pnand %p648_p1, %p634_p2  ;;  %p656_p4 = scmp.lt.s32.totalorder %s654_s18, %s647_s4 }
  0x2c   : > { %p651_p11 = pneg %p650_p3  ;;  %p657_p6 = por %p656_p4, %p655_p9 }
  0x2e   : > { %p658_p7 = pnand %p657_p6, %p651_p11 }
  0x30   : > { %661 = shalt.err (!%p658_p7)
}
  0x31   : > { %s813_s11 = smov 128   ;;  %s814_s19 = smov 8  }
  0x32   : > { %566 = dma.hbm_to_vmem [thread:$0]  (!%p922_p13), %s914_s6, 256, %s918_s8, %s165_s10, %s813_s11, %s813_s11, %s814_s19  }
  0x33   : > { %p208_p9 = scmp.lt.s32.totalorder %s810_s17, 9  ;;  %s964_s23 = scalar_lea.hbm %s1150_s1, %s553_s30 }
  0x34   : > { %p1160_p11 = scmp.ge.s32.totalorder %s810_s17, 1  ;;  %s191_s5 = scalar_lea.vmem [#allocation5], %s540_s29 }
  0x35   : > { %s200_s7 = sshll.u32 %s191_s5, 4  ;;  %s188_s6 = scalar_lea.sflag [#allocation6], %s905_s28  ;;  %s974_s7 = int_to_ptr.vmem [resolvable:$true] %s200_s7 }
  0x36   : > { %p968_p0 = pnand %p1160_p11, %p208_p9  ;;  %s662_s8 = scalar_lea.hbm %s964_s23, 256 }
  0x37   : > { %p663_p5 = scmp.ne.s32.totalorder %s964_s23, %s662_s8  ;;  %s667_s18 = scalar_lea.hbm %s1150_s1, 2048 }
  0x38   : > { %p668_p1 = scmp.lt.u32.totalorder %s964_s23, %s1150_s1  ;;  %p669_p3 = scmp.lt.u32.totalorder %s667_s18, %s662_s8 }
  0x39   : > { %p665_p10 = pnand %p663_p5, %p634_p2  ;;  %p671_p6 = scmp.lt.u32.totalorder %s662_s8, %s964_s23 }
  0x3a   : > { %p670_p4 = por %p669_p3, %p668_p1 }
  0x3b   : > { %p666_p12 = pneg %p665_p10 }
  0x3c   : > { %p672_p7 = por %p671_p6, %p670_p4 }
  0x3e   : > { %p673_p9 = pnand %p672_p7, %p666_p12 }
  0x40   : > { %676 = shalt.err (!%p673_p9)
}
  0x41   : > { %s677_s29 = scalar_lea.vmem %s974_s7, 256  ;;  %s815_s5 = smov [#allocation5]  }
  0x42   : > { %p678_p11 = scmp.ne.s32.totalorder %s974_s7, %s677_s29  ;;  %s682_s30 = sshll.u32 %s815_s5, 4  ;;  %s683_s30 = int_to_ptr.vmem [resolvable:$false] %s682_s30 }
  0x43   : > { %s684_s10 = scalar_lea.vmem %s683_s30, 512  ;;  %p685_p8 = scmp.lt.s32.totalorder %s974_s7, %s683_s30 }
  0x44   : > { %p680_p5 = pnand %p678_p11, %p634_p2  ;;  %p686_p1 = scmp.lt.s32.totalorder %s684_s10, %s677_s29 }
  0x46   : > { %p681_p10 = pneg %p680_p5  ;;  %p687_p3 = por %p686_p1, %p685_p8 }
  0x48   : > { %p688_p4 = pnand %p687_p3, %p681_p10 }
  0x4a   : > { %691 = shalt.err (!%p688_p4)
}
  0x4b   : > { %569 = dma.hbm_to_vmem [thread:$0]  (!%p922_p13), %s964_s23, 256, %s974_s7, %s188_s6, %s813_s11, %s813_s11, %s814_s19  }
  0x4c   : > { %212 = sbr.rel (%p968_p0) target bundleno = 369 (0x171), region = 28  ;;  %s1008_s8 = sand.u32 (!%p968_p0), 1, %s794_s13  }
  0x4d   : > { %s547_s18 = sshll.u32 (!%p968_p0), %s1008_s8, 4  ;;  %s215_s21 = scalar_lea.sflag (!%p968_p0), [#allocation3], %s1008_s8 }
  0x4e   : > { %s218_s9 = scalar_lea.vmem (!%p968_p0), [#allocation2], %s547_s18  ;;  %p1162_p8 = scmp.ne.s32.totalorder (!%p968_p0), %s1156_s24, 0 }
  0x53   : > { %773 = dma.done.wait (%p1162_p8), %s215_s21, 256  }
  0x54   : > { %775 = vsyncadd (%p1162_p8), %s215_s21, 4294967040  ;;  %s224_s28 = scalar_lea.sflag [#allocation6], %s1008_s8  ;;  %s227_s11 = scalar_lea.vmem [#allocation5], %s547_s18 }
  0x55   : > { %777 = dma.done.wait (%p1162_p8), %s224_s28, 256  }
  0x56   : > { %779 = vsyncadd (%p1162_p8), %s224_s28, 4294967040  ;;  %v1021_v0 = vld [vmem:[%s227_s11] sm:$0xff]  ;;  %s816_s19 = smov 1   ;;  %v1027_v2 = vld [vmem:[%s227_s11 + $0x8] sm:$0xff]  ;;  %vm277_vm0 = vcmask 130048   ;;  %s817_s24 = smov 127  }
  0x57   : > { %v1023_v1 = vld [vmem:[%s218_s9] sm:$0xff]  ;;  %325 = vrot.lane.b32.xlu1 %v1021_v0, %s816_s19  ;;  %v1029_v3 = vld [vmem:[%s218_s9 + $0x8] sm:$0xff]  ;;  %vm292_vm1 = vcmask 1040384   ;;  %vm264_vm2 = vcmask 122880   ;;  %vm266_vm3 = vcmask 114688   ;;  %s251_s23 = scalar_lea.vmem [#allocation7], %s1008_s8 }
  0x58   : > { %315 = vrot.lane.b32.xlu0 %v1023_v1, %s816_s19  ;;  %v272_v4 = vsub.f32 %v1023_v1, %v1021_v0  ;;  %v273_v5 = vsub.f32 %v1029_v3, %v1027_v2  ;;  %v818_v31 = vmov 0.0   ;;  %s1045_s4 = scalar_lea.vmem [#allocation8], %s1008_s8  ;;  %s549_s7 = sshll.u32 %s802_s15, 4 }
  0x59   : > { %265 = vst.msk [vmem:[%s251_s23] sm:$0x1] %vm264_vm2, %v818_v31  ;;  %s392_s6 = sshll.u32 %s251_s23, 4  ;;  %s1055_s5 = scalar_lea.hbm %s1151_s2, %s549_s7  ;;  %s1057_s6 = int_to_ptr.vmem [resolvable:$true] %s392_s6 }
  0x5a   : > { %v274_v6 = vand.u32 2147483647, %v272_v4  ;;  %v275_v7 = vand.u32 2147483647, %v273_v5  ;;  %267 = vst.msk [vmem:[%s1045_s4] sm:$0x1] %vm266_vm3, %v818_v31 }
  0x5b   : > { %327 = vrot.lane.b32.xlu1 %v1027_v2, %s816_s19  ;;  %s376_s30 = scalar_lea.sflag [#allocation4], %s1008_s8  ;;  %s692_s10 = scalar_lea.vmem %s1057_s6, 16 }
  0x5c   : > { %317 = vrot.lane.b32.xlu0 %v1029_v3, %s816_s19  ;;  %v278_v8 = vsel %vm277_vm0, %v274_v6, 0.0  ;;  %v279_v9 = vsel %vm277_vm0, %v275_v7, 0.0  ;;  %p693_p13 = scmp.ne.s32.totalorder %s1057_s6, %s692_s10  ;;  %p1163_p2 = scmp.ne.s32.totalorder %s1157_s25, 0 }
  0x5d   : > { %v280_v12 = vadd.f32 %v279_v9, %v278_v8  ;;  %s819_s18 = smov [#allocation7]  }
  0x5e   : > { %p694_p0 = pnand %p693_p13, %p1163_p2  ;;  %s696_s21 = sshll.u32 %s819_s18, 4  ;;  %s697_s21 = int_to_ptr.vmem [resolvable:$false] %s696_s21 }
  0x5f   : > { %v281_v19 = vrot.slane %v280_v12, 4  ;;  %s698_s9 = scalar_lea.vmem %s697_s21, 32  ;;  %p699_p6 = scmp.lt.s32.totalorder %s1057_s6, %s697_s21 }
  0x60   : > { %v276_v35 = vld [vmem:[%s251_s23] sm:$0x1]  ;;  %p695_p12 = pneg %p694_p0  ;;  %p700_p7 = scmp.lt.s32.totalorder %s698_s9, %s692_s10 }
  0x61   : > { %v282_v26 = vadd.f32 %v281_v19, %v280_v12 }
  0x62   : > { %p701_p9 = por %p700_p7, %p699_p6 }
  0x63   : > { %v283_v29 = vrot.slane %v282_v26, 2 }
  0x64   : > { %p702_p11 = pnand %p701_p9, %p695_p12 }
  0x65   : > { %v284_v32 = vadd.f32 %v283_v29, %v282_v26 }
  0x67   : > { %v285_v33 = vrot.slane %v284_v32, 1 }
  0x69   : > { %v286_v34 = vadd.f32 %v285_v33, %v284_v32 }
  0x6b   : > { %v287_v36 = vadd.f32 %v286_v34, %v276_v35 }
  0x6d   : > { %289 = vst.msk [vmem:[%s251_s23] sm:$0x1] %vm264_vm2, %v287_v36 }
  0xc9   : > { %v326_v10 = vpop.permute.xlu1 %325 }
  0xca   : > { %v316_v11 = vpop.permute.xlu0 %315  ;;  %v331_v13 = vsub.f32 %v1021_v0, %v326_v10 }
  0xcb   : > { %v321_v14 = vsub.f32 %v1023_v1, %v316_v11 }
  0xcc   : > { %v333_v15 = vand.u32 2147483647, %v331_v13 }
  0xcd   : > { %v323_v16 = vand.u32 2147483647, %v321_v14  ;;  %v328_v17 = vpop.permute.xlu1 %327 }
  0xce   : > { %v318_v18 = vpop.permute.xlu0 %317  ;;  %v332_v21 = vsub.f32 %v1027_v2, %v328_v17 }
  0xcf   : > { %v335_v20 = vsub.f32 %v323_v16, %v333_v15  ;;  %v322_v22 = vsub.f32 %v1029_v3, %v318_v18 }
  0xd0   : > { %v334_v24 = vand.u32 2147483647, %v332_v21 }
  0xd1   : > { %v339_v23 = vrot.slane %v335_v20, 7  ;;  %v324_v25 = vand.u32 2147483647, %v322_v22 }
  0xd3   : > { %v336_v27 = vsub.f32 %v324_v25, %v334_v24  ;;  %342 = vrot.lane.b32.xlu0 %v339_v23, %s817_s24 }
  0xd5   : > { %v340_v28 = vrot.slane %v336_v27, 7 }
  0xd7   : > { %v341_v30 = vsel %vm292_vm1, %v339_v23, %v340_v28 }
  0xd8   : > { %344 = vrot.lane.b32.xlu1 %v341_v30, %s817_s24 }
  0xd9   : > { %705 = shalt.err (!%p702_p11)
}
  0xda   : > { %s706_s28 = scalar_lea.hbm %s1055_s5, 16  ;;  %s710_s24 = scalar_lea.hbm %s1151_s2, 128 }
  0xdb   : > { %p707_p5 = scmp.ne.s32.totalorder %s1055_s5, %s706_s28  ;;  %p711_p3 = scmp.lt.u32.totalorder %s1055_s5, %s1151_s2 }
  0xdc   : > { %p712_p4 = scmp.lt.u32.totalorder %s710_s24, %s706_s28  ;;  %p714_p13 = scmp.lt.u32.totalorder %s706_s28, %s1055_s5 }
  0xdd   : > { %p708_p10 = pnand %p707_p5, %p1163_p2 }
  0xde   : > { %p713_p8 = por %p712_p4, %p711_p3 }
  0xdf   : > { %p709_p1 = pneg %p708_p10 }
  0xe0   : > { %p715_p0 = por %p714_p13, %p713_p8 }
  0xe2   : > { %p716_p12 = pnand %p715_p0, %p709_p1 }
  0xe4   : > { %719 = shalt.err (!%p716_p12)
}
  0xe5   : > { %559 = dma.vmem_to_hbm [thread:$0]  (%p1163_p2), %s1057_s6, 16, %s1055_s5, %s376_s30   ;;  %v304_v37 = vrot.slane %v1021_v0, 7  ;;  %v293_v38 = vrot.slane %v1023_v1, 7  ;;  %v294_v39 = vrot.slane %v1029_v3, 7  ;;  %v305_v40 = vrot.slane %v1027_v2, 7 }
  0xe6   : > { %vm355_vm4 = vcmask 1046528   ;;  %vm363_vm5 = vcmask 120832   ;;  %vm361_vm6 = vcmask 121856   ;;  %v352_v6 = vld [vmem:[%s1045_s4] sm:$0x1]  ;;  %s405_s6 = sshll.u32 %s1045_s4, 4  ;;  %s1099_s30 = scalar_lea.hbm %s1152_s3, %s549_s7  ;;  %s1101_s6 = int_to_ptr.vmem [resolvable:$true] %s405_s6 }
  0xe7   : > { %v309_v41 = vsub.f32 %v1021_v0, %v304_v37  ;;  %v298_v42 = vsub.f32 %v1023_v1, %v293_v38  ;;  %v306_v43 = vsel %vm292_vm1, %v304_v37, %v305_v40  ;;  %v295_v44 = vsel %vm292_vm1, %v293_v38, %v294_v39  ;;  %s380_s10 = scalar_lea.sflag [#allocation9], %s1008_s8  ;;  %s720_s18 = scalar_lea.vmem %s1101_s6, 16 }
  0xe8   : > { %v310_v47 = vsub.f32 %v1027_v2, %v306_v43  ;;  %v299_v48 = vsub.f32 %v1029_v3, %v295_v44  ;;  %p721_p6 = scmp.ne.s32.totalorder %s1101_s6, %s720_s18  ;;  %s820_s21 = smov [#allocation8]  }
  0xe9   : > { %v311_v45 = vand.u32 2147483647, %v309_v41  ;;  %v300_v46 = vand.u32 2147483647, %v298_v42  ;;  %s724_s15 = sshll.u32 %s820_s21, 4  ;;  %s725_s15 = int_to_ptr.vmem [resolvable:$false] %s724_s15 }
  0xea   : > { %v312_v50 = vand.u32 2147483647, %v310_v47  ;;  %v301_v51 = vand.u32 2147483647, %v299_v48  ;;  %p722_p7 = pnand %p721_p6, %p1163_p2  ;;  %s726_s9 = scalar_lea.vmem %s725_s15, 32 }
  0xeb   : > { %v313_v49 = vsub.f32 %v300_v46, %v311_v45  ;;  %p727_p11 = scmp.lt.s32.totalorder %s1101_s6, %s725_s15  ;;  %p728_p5 = scmp.lt.s32.totalorder %s726_s9, %s720_s18 }
  0xec   : > { %v314_v54 = vsub.f32 %v301_v51, %v312_v50  ;;  %p723_p9 = pneg %p722_p7 }
  0xed   : > { %p729_p10 = por %p728_p5, %p727_p11 }
  0xef   : > { %p730_p1 = pnand %p729_p10, %p723_p9 }
 0x145   : > { %v343_v52 = vpop.permute.xlu0 %342 }
 0x146   : > { %v348_v53 = vadd.f32 %v343_v52, %v313_v49 }
 0x148   : > { %v350_v56 = vand.u32 2147483647, %v348_v53 }
 0x14a   : > { %v345_v55 = vpop.permute.xlu1 %344  ;;  %v356_v59 = vrot.slane %v350_v56, 1 }
 0x14b   : > { %v349_v57 = vadd.f32 %v345_v55, %v314_v54 }
 0x14d   : > { %v351_v58 = vand.u32 2147483647, %v349_v57 }
 0x14f   : > { %v357_v60 = vrot.slane %v351_v58, 1 }
 0x151   : > { %v358_v61 = vsel %vm355_vm4, %v356_v59, %v357_v60  ;;  %v364_v62 = vsel %vm363_vm5, %v357_v60, 0.0 }
 0x152   : > { %v362_v63 = vsel %vm361_vm6, %v358_v61, 0.0 }
 0x153   : > { %v365_v0 = vadd.f32 %v364_v62, %v362_v63 }
 0x155   : > { %v366_v1 = vrot.slane %v365_v0, 4 }
 0x157   : > { %v367_v2 = vadd.f32 %v366_v1, %v365_v0 }
 0x159   : > { %v368_v3 = vrot.slane %v367_v2, 2 }
 0x15b   : > { %v369_v4 = vadd.f32 %v368_v3, %v367_v2 }
 0x15d   : > { %v370_v5 = vrot.slane %v369_v4, 1 }
 0x15f   : > { %v371_v7 = vadd.f32 %v370_v5, %v369_v4 }
 0x161   : > { %v372_v8 = vadd.f32 %v371_v7, %v352_v6 }
 0x163   : > { %374 = vst.msk [vmem:[%s1045_s4] sm:$0x1] %vm266_vm3, %v372_v8 }
 0x164   : > { %733 = shalt.err (!%p730_p1)
}
 0x165   : > { %s734_s8 = scalar_lea.hbm %s1099_s30, 16  ;;  %s738_s28 = scalar_lea.hbm %s1152_s3, 128 }
 0x166   : > { %p735_p3 = scmp.ne.s32.totalorder %s1099_s30, %s734_s8  ;;  %p739_p13 = scmp.lt.u32.totalorder %s1099_s30, %s1152_s3 }
 0x167   : > { %p740_p0 = scmp.lt.u32.totalorder %s738_s28, %s734_s8  ;;  %p742_p6 = scmp.lt.u32.totalorder %s734_s8, %s1099_s30 }
 0x168   : > { %p736_p4 = pnand %p735_p3, %p1163_p2 }
 0x169   : > { %p741_p12 = por %p740_p0, %p739_p13 }
 0x16a   : > { %p737_p8 = pneg %p736_p4 }
 0x16b   : > { %p743_p7 = por %p742_p6, %p741_p12 }
 0x16d   : > { %p744_p9 = pnand %p743_p7, %p737_p8 }
 0x16f   : > { %747 = shalt.err (!%p744_p9)
}
 0x170   : > { %560 = dma.vmem_to_hbm [thread:$0]  (%p1163_p2), %s1101_s6, 16, %s1099_s30, %s380_s10  }
 0x171 PF: > { %p578_p11 = scmp.ge.s32.totalorder %s810_s17, 2  ;;  %s417_s24 = sand.u32 1, %s790_s12  }
 0x172   : > { %p1164_p5 = scmp.ne.s32.totalorder %s1158_s27, 0  ;;  %s418_s23 = scalar_lea.sflag [#allocation4], %s417_s24 }
 0x174   : > { %p571_p10 = pnand %p578_p11, %p1164_p5 }
 0x176   : > { %781 = dma.done.wait (!%p571_p10), %s418_s23, 16  }
 0x177   : > { %783 = vsyncadd (!%p571_p10), %s418_s23, 4294967280  ;;  %s426_s22 = scalar_lea.sflag [#allocation9], %s417_s24 }
 0x178   : > { %785 = dma.done.wait (!%p571_p10), %s426_s22, 16  }
 0x179   : > { %787 = vsyncadd (!%p571_p10), %s426_s22, 4294967280  ;;  %s26_s17 = sadd.s32 1, %s810_s17   ;;  %s1165_s12 = smov %s794_s13 }
 0x17a   : > { %p23_p1 = scmp.ge.s32.totalorder %s26_s17, 10   ;;  %s1166_s13 = smov %s798_s14 }
 0x17b   : > { %s1167_s14 = smov %s897_s26  ;;  %s1168_s15 = smov %s806_s16 }
 0x17c   : > { %s1169_s16 = smov %s1171_s20  ;;  %25 = sbr.rel (!%p23_p1) target bundleno = 10 (0xa), region = 107 }
 0x183   :  { %430 = vsyncpa [#allocation3], 1 }
 0x184   :  { %432 = vsyncpa [#allocation3 + $0x1], 1 }
 0x185   :  { %433 = vsyncpa [#allocation6], 1 }
 0x186   :  { %435 = vsyncpa [#allocation6 + $0x1], 1 }
 0x187   :  { %436 = vsyncpa [#allocation4], 1 }
 0x188   :  { %438 = vsyncpa [#allocation4 + $0x1], 1 }
 0x189   :  { %439 = vsyncpa [#allocation9], 1 }
 0x18a   :  { %441 = vsyncpa [#allocation9 + $0x1], 1 }

</bundles_post_ra>
